<compile_context>
chip_gen: v7x
topology: tpu7x:2x2x1
jax: 0.10.0
libtpu: 0.0.40
codegen_flags: <defaults>
</compile_context>

<pallas_src>
import functools

import jax
import jax.numpy as jnp
from jax.experimental import pallas as pl
from jax.experimental.pallas import tpu as pltpu


# ------------------------------- helpers ------------------------------------

def _round_up(x, m):
    return ((x + m - 1) // m) * m


def _pick_tile(dim, cap):
    """Largest multiple of 128 that divides `dim` (a 128-multiple) and <= cap."""
    t = max(128, min(dim, (cap // 128) * 128))
    while dim % t != 0:
        t -= 128
    return t


def _pad2(a, rows, cols):
    r, c = a.shape
    if r == rows and c == cols:
        return a
    return jnp.pad(a, ((0, rows - r), (0, cols - c)))


def _hw_config():
    """Per-generation tile caps / VMEM limit (conservative default = v7x)."""
    try:
        kind = jax.devices()[0].device_kind.lower()
    except Exception:
        kind = ""
    if ("v5" in kind) or ("v6" in kind):
        # 128 MiB physical VMEM, single TensorCore: maximize tile size.
        return dict(tk_cap=3584, tn_cap=4096, vmem_limit=100 * 1024 * 1024)
    # v7x (64 MiB VMEM, 2 TCs) and unknown chips: keep the double-buffered
    # weight tile well under the limit and >=2 N tiles for megacore sharding.
    return dict(tk_cap=3584, tn_cap=2048, vmem_limit=48 * 1024 * 1024)


# ------------------------------- kernel -------------------------------------

def _linear_relu_kernel(x_ref, w_ref, s_ref, b_ref, o_ref, *, tk):
    """relu((x @ w_q) * scale + bias), K-inner accumulation into o_ref.

    x_ref: (Bp, Kp) bf16, whole-array resident block.
    w_ref: (tk, tn) int8 streamed weight tile (storage dtype; MXU runs bf16).
    s_ref: (1, tn) f32 per-output-channel dequant scale.
    b_ref: (1, tn) f32 bias.
    o_ref: (Bp, tn) f32 output block, resident across the K axis.
    """
    k = pl.program_id(1)

    @pl.when(k == 0)
    def _init():
        o_ref[...] = jnp.zeros_like(o_ref)

    start = pl.multiple_of(k * tk, 128)
    x_blk = x_ref[:, pl.ds(start, tk)]              # bf16, aligned lane slice
    w_blk = w_ref[...].astype(jnp.bfloat16)         # int8 -> bf16 is exact
    o_ref[...] += jnp.dot(x_blk, w_blk, preferred_element_type=jnp.float32)

    @pl.when(k == pl.num_programs(1) - 1)
    def _epilogue():
        # Dequant scale + bias + ReLU once per N tile; lane-dense f32 store.
        o_ref[...] = jnp.maximum(o_ref[...] * s_ref[...] + b_ref[...], 0.0)


def _linear_relu(x_bf16, w_q, scale, bias, *, cfg):
    """relu((x @ dequant(w_q)) + b) via a K/N tiled weight-streaming kernel.

    x_bf16: (Bp, Kp) bf16, Bp % 8 == 0, Kp % 128 == 0.
    w_q:    (Kp, Np) int8, Np % 128 == 0.
    scale/bias: (1, Np) f32.  Returns (Bp, Np) f32.
    """
    Bp, Kp = x_bf16.shape
    Kp2, Np = w_q.shape
    assert Kp == Kp2 and Bp % 8 == 0 and Kp % 128 == 0 and Np % 128 == 0

    tk = _pick_tile(Kp, cfg["tk_cap"])
    tn = _pick_tile(Np, cfg["tn_cap"])
    grid = (Np // tn, Kp // tk)

    cost = pl.CostEstimate(
        flops=2 * Bp * Kp * Np,
        transcendentals=0,
        bytes_accessed=(Bp * Kp * 2          # bf16 activations, read once
                        + Kp * Np * 1        # int8 weights, read once
                        + 2 * Np * 4         # scale + bias
                        + Bp * Np * 4),      # f32 output
    )

    return pl.pallas_call(
        functools.partial(_linear_relu_kernel, tk=tk),
        out_shape=jax.ShapeDtypeStruct((Bp, Np), jnp.float32),
        grid_spec=pltpu.PrefetchScalarGridSpec(
            num_scalar_prefetch=0,
            grid=grid,
            in_specs=[
                pl.BlockSpec((Bp, Kp), lambda j, k: (0, 0)),  # resident activations
                pl.BlockSpec((tk, tn), lambda j, k: (k, j)),  # streamed int8 weights
                pl.BlockSpec((1, tn), lambda j, k: (0, j)),   # per-channel scales
                pl.BlockSpec((1, tn), lambda j, k: (0, j)),   # bias row
            ],
            out_specs=pl.BlockSpec((Bp, tn), lambda j, k: (0, j)),
        ),
        compiler_params=pltpu.CompilerParams(
            dimension_semantics=("parallel", "arbitrary"),
            vmem_limit_bytes=cfg["vmem_limit"],
        ),
        cost_estimate=cost,
    )(x_bf16, w_q, scale, bias)


# --------------------- one-time parameter preparation -----------------------

def _quantize_int8(w_pad):
    """Symmetric per-output-channel int8 quantization of a zero-padded weight."""
    amax = jnp.max(jnp.abs(w_pad), axis=0, keepdims=True)
    scale = jnp.where(amax > 0.0, amax / 127.0, 1.0).astype(jnp.float32)
    w_q = jnp.clip(jnp.round(w_pad / scale), -127.0, 127.0).astype(jnp.int8)
    return w_q, scale


def prepare_params(params):
    """One-time weight prep (call at load time, NOT per forward):
    pad to TPU tiles, fuse the two tiny head matmuls, int8-quantize weights."""
    w1, b1 = params["w1"], params["b1"]
    w2, b2 = params["w2"], params["b2"]
    wc, bc = params["wc"], params["bc"]
    wa, ba = params["wa"], params["ba"]

    d_in, hidden = w1.shape
    n_cat, n_attr = wc.shape[1], wa.shape[1]
    Dp = _round_up(d_in, 128)
    Hp = _round_up(hidden, 128)
    Np = _round_up(n_cat + n_attr, 128)

    # Fuse the two tiny head matmuls into one lane-dense matmul; the split
    # into [cat, attr] happens in the wrapper (avoids masked vst.msk stores).
    w_head = jnp.concatenate([wc, wa], axis=1)
    b_head = jnp.concatenate([bc, ba], axis=1)

    def prep(w, b, rows, cols):
        w_q, scale = _quantize_int8(_pad2(w.astype(jnp.float32), rows, cols))
        return w_q, scale, _pad2(b.astype(jnp.float32), 1, cols)

    w1q, s1, b1p = prep(w1, b1, Dp, Hp)
    w2q, s2, b2p = prep(w2, b2, Hp, Hp)
    whq, sh, bhp = prep(w_head, b_head, Hp, Np)

    prepared = dict(w1=w1q, s1=s1, b1=b1p,
                    w2=w2q, s2=s2, b2=b2p,
                    wh=whq, sh=sh, bh=bhp)
    meta = dict(d_in=d_in, hidden=hidden, n_cat=n_cat, n_attr=n_attr)
    return prepared, meta


# ------------------------------ forward pass --------------------------------

def finetune_forward(x_nchw, prepared, meta, cfg=None):
    """Fine-tune head forward (vgg16 path) on prepared params -> [cat, attr].

    Per-forward work is only: flatten/pad/cast the (tiny) activations and three
    weight-streaming pallas_calls.  jit-compatible.
    """
    if cfg is None:
        cfg = _hw_config()

    B = x_nchw.shape[0]
    f = x_nchw.reshape(B, -1)                        # == f.view(f.size(0), -1)

    Dp = prepared["w1"].shape[0]
    Bp = _round_up(B, 8)
    f_p = _pad2(f, Bp, Dp).astype(jnp.bfloat16)      # cast activations once

    # relu(linear1(f).clamp(min=0)) == relu(linear1(f))
    h1 = _linear_relu(f_p, prepared["w1"], prepared["s1"], prepared["b1"], cfg=cfg)
    h2 = _linear_relu(h1.astype(jnp.bfloat16),
                      prepared["w2"], prepared["s2"], prepared["b2"], cfg=cfg)
    head = _linear_relu(h2.astype(jnp.bfloat16),
                        prepared["wh"], prepared["sh"], prepared["bh"], cfg=cfg)

    n_cat, n_attr = meta["n_cat"], meta["n_attr"]
    cat = head[:B, :n_cat]
    attr = head[:B, n_cat:n_cat + n_attr]
    return [cat, attr]


def _init_params(key, d_in, hidden, n_cat, n_attr):
    ks = jax.random.split(key, 8)
    scale = 0.02
    return {
        "w1": scale * jax.random.normal(ks[0], (d_in, hidden), jnp.float32),
        "b1": scale * jax.random.normal(ks[1], (1, hidden), jnp.float32),
        "w2": scale * jax.random.normal(ks[2], (hidden, hidden), jnp.float32),
        "b2": scale * jax.random.normal(ks[3], (1, hidden), jnp.float32),
        "wc": scale * jax.random.normal(ks[4], (hidden, n_cat), jnp.float32),
        "bc": scale * jax.random.normal(ks[5], (1, n_cat), jnp.float32),
        "wa": scale * jax.random.normal(ks[6], (hidden, n_attr), jnp.float32),
        "ba": scale * jax.random.normal(ks[7], (1, n_attr), jnp.float32),
    }


if __name__ == "__main__":
    # Small shapes consistent with the module's forward:
    # backbone feature map (B, C, H, W) -> flattened Din = C*H*W.
    B, C, Hs, Ws = 2, 8, 4, 4          # Din = 128 (stand-in for vgg's 25088)
    HIDDEN = 256                       # stand-in for 4096
    N_CAT = 16                         # helper.Num_category_classes (synthetic)
    N_ATTR = 32                        # helper.Num_attribute_classes_general (synthetic)

    key = jax.random.PRNGKey(0)
    k_x, k_p = jax.random.split(key)

    x = jax.random.normal(k_x, (B, C, Hs, Ws), jnp.float32)   # NCHW feature map
    params = _init_params(k_p, C * Hs * Ws, HIDDEN, N_CAT, N_ATTR)

    # One-time prep (load time), then streaming-only forward.
    prepared, meta = prepare_params(params)
    prepared = jax.tree_util.tree_map(jax.block_until_ready, prepared)

    outs = finetune_forward(x, prepared, meta)
    outs = [jax.block_until_ready(o) for o in outs]

    # Reference in plain f32 JAX (kernel streams int8 weights + bf16
    # activations -> loose tolerance).
    f = x.reshape(B, -1)
    h1 = jnp.maximum(f @ params["w1"] + params["b1"], 0.0)
    h2 = jnp.maximum(h1 @ params["w2"] + params["b2"], 0.0)
    ref_cat = jnp.maximum(h2 @ params["wc"] + params["bc"], 0.0)
    ref_attr = jnp.maximum(h2 @ params["wa"] + params["ba"], 0.0)

    assert outs[0].shape == (B, N_CAT) and outs[1].shape == (B, N_ATTR)
    assert jnp.allclose(outs[0], ref_cat, atol=2e-2, rtol=2e-2)
    assert jnp.allclose(outs[1], ref_attr, atol=2e-2, rtol=2e-2)

    print("KERNEL_OK")
</pallas_src>

<mosaic_0001>
module attributes {stable_mosaic.version = 11 : i64} {
  func.func @_linear_relu_kernel(%arg0: i32, %arg1: i32, %arg2: memref<8x128xbf16, #tpu.memory_space<vmem>>, %arg3: memref<128x256xi8, #tpu.memory_space<vmem>>, %arg4: memref<1x256xf32, #tpu.memory_space<vmem>>, %arg5: memref<1x256xf32, #tpu.memory_space<vmem>>, %arg6: memref<8x256xf32, #tpu.memory_space<vmem>>) attributes {dimension_semantics = [#tpu.dimension_semantics<parallel>, #tpu.dimension_semantics<arbitrary>], iteration_bounds = array<i64: 1, 1>, scalar_prefetch = 0 : i64, scratch_operands = 0 : i64, tpu.core_type = #tpu.core_type<tc>, window_params = [{pipeline_mode = #tpu.pipeline_mode<synchronous>, transform_indices = @transform_0, window_bounds = array<i64: 8, 128>}, {transform_indices = @transform_1, window_bounds = array<i64: 128, 256>}, {transform_indices = @transform_2, window_bounds = array<i64: 1, 256>}, {transform_indices = @transform_3, window_bounds = array<i64: 1, 256>}, {transform_indices = @transform_4, window_bounds = array<i64: 8, 256>}]} {
    %c0_i32 = arith.constant 0 : i32
    %0 = arith.cmpi eq, %arg1, %c0_i32 : i32
    %1 = arith.extui %0 : i1 to i32
    %c0_i32_0 = arith.constant 0 : i32
    %2 = arith.cmpi ne, %1, %c0_i32_0 : i32
    scf.if %2 {
      %cst_9 = arith.constant 0.000000e+00 : f32
      %16 = vector.broadcast %cst_9 : f32 to vector<8x256xf32>
      %c0_10 = arith.constant 0 : index
      %c0_11 = arith.constant 0 : index
      %17 = vector.load %arg6[%c0_10, %c0_11] : memref<8x256xf32, #tpu.memory_space<vmem>>, vector<8x256xf32>
      tpu.vector_store %arg6[%c0_10, %c0_11], %16 {strides = array<i32>} : memref<8x256xf32, #tpu.memory_space<vmem>>, vector<8x256xf32>,
    } else {
    }
    %c128_i32 = arith.constant 128 : i32
    %3 = arith.muli %arg1, %c128_i32 : i32
    %4 = tpu.assume_multiple %3, 128 : i32
    %c0 = arith.constant 0 : index
    %5 = arith.index_cast %4 : i32 to index
    %6 = vector.load %arg2[%c0, %5] : memref<8x128xbf16, #tpu.memory_space<vmem>>, vector<8x128xbf16>
    %c0_1 = arith.constant 0 : index
    %c0_2 = arith.constant 0 : index
    %7 = vector.load %arg3[%c0_1, %c0_2] : memref<128x256xi8, #tpu.memory_space<vmem>>, vector<128x256xi8>
    %8 = arith.sitofp %7 : vector<128x256xi8> to vector<128x256xbf16>
    %c0_3 = arith.constant 0 : index
    %c0_4 = arith.constant 0 : index
    %9 = vector.load %arg6[%c0_3, %c0_4] : memref<8x256xf32, #tpu.memory_space<vmem>>, vector<8x256xf32>
    %cst = arith.constant dense<0.000000e+00> : vector<8x256xf32>
    %10 = tpu.matmul %6, %8, %cst {dimension_numbers = #tpu.dot_dimension_numbers<[1], [0], [0], [1], [0, 0, 1, 1], [], []>} : vector<8x128xbf16>, vector<128x256xbf16>, vector<8x256xf32> -> vector<8x256xf32>
    %11 = arith.addf %9, %10 : vector<8x256xf32>
    %c0_5 = arith.constant 0 : index
    %c0_6 = arith.constant 0 : index
    %12 = vector.load %arg6[%c0_5, %c0_6] : memref<8x256xf32, #tpu.memory_space<vmem>>, vector<8x256xf32>
    tpu.vector_store %arg6[%c0_5, %c0_6], %11 {strides = array<i32>} : memref<8x256xf32, #tpu.memory_space<vmem>>, vector<8x256xf32>,
    %c0_i32_7 = arith.constant 0 : i32
    %13 = arith.cmpi eq, %arg1, %c0_i32_7 : i32
    %14 = arith.extui %13 : i1 to i32
    %c0_i32_8 = arith.constant 0 : i32
    %15 = arith.cmpi ne, %14, %c0_i32_8 : i32
    scf.if %15 {
      %c0_9 = arith.constant 0 : index
      %c0_10 = arith.constant 0 : index
      %16 = vector.load %arg6[%c0_9, %c0_10] : memref<8x256xf32, #tpu.memory_space<vmem>>, vector<8x256xf32>
      %c0_11 = arith.constant 0 : index
      %c0_12 = arith.constant 0 : index
      %17 = vector.load %arg4[%c0_11, %c0_12] : memref<1x256xf32, #tpu.memory_space<vmem>>, vector<1x256xf32>
      %18 = vector.broadcast %17 : vector<1x256xf32> to vector<8x256xf32>
      %19 = arith.mulf %16, %18 : vector<8x256xf32>
      %c0_13 = arith.constant 0 : index
      %c0_14 = arith.constant 0 : index
      %20 = vector.load %arg5[%c0_13, %c0_14] : memref<1x256xf32, #tpu.memory_space<vmem>>, vector<1x256xf32>
      %21 = vector.broadcast %20 : vector<1x256xf32> to vector<8x256xf32>
      %22 = arith.addf %19, %21 : vector<8x256xf32>
      %cst_15 = arith.constant 0.000000e+00 : f32
      %23 = vector.broadcast %cst_15 : f32 to vector<8x256xf32>
      %24 = arith.maximumf %22, %23 : vector<8x256xf32>
      %c0_16 = arith.constant 0 : index
      %c0_17 = arith.constant 0 : index
      %25 = vector.load %arg6[%c0_16, %c0_17] : memref<8x256xf32, #tpu.memory_space<vmem>>, vector<8x256xf32>
      tpu.vector_store %arg6[%c0_16, %c0_17], %24 {strides = array<i32>} : memref<8x256xf32, #tpu.memory_space<vmem>>, vector<8x256xf32>,
    } else {
    }
    return
  }
  func.func @transform_0(%arg0: i32, %arg1: i32) -> (i32, i32) {
    %c0_i32 = arith.constant 0 : i32
    %c0_i32_0 = arith.constant 0 : i32
    %c0_i32_1 = arith.constant 0 : i32
    return %c0_i32, %c0_i32_0 : i32, i32
  }
  func.func @transform_1(%arg0: i32, %arg1: i32) -> (i32, i32) {
    %c0_i32 = arith.constant 0 : i32
    return %arg1, %arg0 : i32, i32
  }
  func.func @transform_2(%arg0: i32, %arg1: i32) -> (i32, i32) {
    %c0_i32 = arith.constant 0 : i32
    %c0_i32_0 = arith.constant 0 : i32
    return %c0_i32, %arg0 : i32, i32
  }
  func.func @transform_3(%arg0: i32, %arg1: i32) -> (i32, i32) {
    %c0_i32 = arith.constant 0 : i32
    %c0_i32_0 = arith.constant 0 : i32
    return %c0_i32, %arg0 : i32, i32
  }
  func.func @transform_4(%arg0: i32, %arg1: i32) -> (i32, i32) {
    %c0_i32 = arith.constant 0 : i32
    %c0_i32_0 = arith.constant 0 : i32
    return %c0_i32, %arg0 : i32, i32
  }
}

</mosaic_0001>

<bundles_post_ra>
// kernel: tpu_custom_call.1
= control target key start
LH: loop header
LB: loop body
LE: loop exit
PB: predicated region body
PF: predicated region fallthrough
CT: control target
= control target key end

     0   :  { %9 = vsyncpa [#allocation3], 0  ;;  %s342_s0 = inlined_call_operand.hbm [shape: bf16[8,128], index: 0, kind: input, shape index: {}]   ;;  %s343_s1 = inlined_call_operand.hbm [shape: s8[128,256], index: 1, kind: input, shape index: {}]   ;;  %s344_s2 = inlined_call_operand.vmem [shape: f32[1,256], index: 2, kind: input, shape index: {}]   ;;  %s345_s3 = inlined_call_operand.vmem [shape: f32[1,256], index: 3, kind: input, shape index: {}]   ;;  %s346_s4 = inlined_call_operand.hbm [shape: f32[8,256], index: 4, kind: output, shape index: {}]  }
   0x1   :  { %10 = vsyncpa [#allocation6], 0 }
   0x2   :  { %11 = vsyncpa [#allocation4], 0  ;;  %s262_s15 = smov [#allocation2]   ;;  %s263_s17 = smov [#allocation5]  }
   0x3   :  { %s18_s16 = sshll.u32 %s262_s15, 4  ;;  %s27_s18 = sshll.u32 %s263_s17, 4  ;;  %s19_s16 = int_to_ptr.vmem [resolvable:$true] %s18_s16  ;;  %s293_s18 = int_to_ptr.vmem [resolvable:$true] %s27_s18 }
   0x4   :  { %s190_s21 = scalar_lea.hbm %s342_s0, 64 }
   0x5   :  { %p191_p0 = scmp.ne.s32.totalorder %s342_s0, %s190_s21  ;;  %p194_p1 = scmp.lt.u32.totalorder %s190_s21, %s342_s0 }
   0x7   :  { %p196_p2 = pnand %p194_p1, %p191_p0 }
   0x9   :  { %199 = shalt.err (!%p196_p2)
}
   0xa   :  { %s200_s26 = scalar_lea.vmem %s19_s16, 64  ;;  %p205_p4 = scmp.lt.s32.totalorder %s19_s16, %s19_s16 }
   0xb   :  { %p201_p3 = scmp.ne.s32.totalorder %s19_s16, %s200_s26  ;;  %p206_p5 = scmp.lt.s32.totalorder %s200_s26, %s200_s26 }
   0xd   :  { %p207_p6 = por %p206_p5, %p205_p4 }
   0xf   :  { %p208_p7 = pnand %p207_p6, %p201_p3 }
  0x11   :  { %211 = shalt.err (!%p208_p7)
}
  0x12   :  { %21 = dma.hbm_to_vmem [thread:$0]  %s342_s0, 64, %s19_s16, [#allocation3]  }
  0x13   :  { %s212_s5 = scalar_lea.hbm %s343_s1, 1024 }
  0x14   :  { %p213_p8 = scmp.ne.s32.totalorder %s343_s1, %s212_s5  ;;  %p216_p9 = scmp.lt.u32.totalorder %s212_s5, %s343_s1 }
  0x16   :  { %p218_p10 = pnand %p216_p9, %p213_p8 }
  0x18   :  { %221 = shalt.err (!%p218_p10)
}
  0x19   :  { %s222_s10 = scalar_lea.vmem %s293_s18, 1024  ;;  %p227_p12 = scmp.lt.s32.totalorder %s293_s18, %s293_s18 }
  0x1a   :  { %p223_p11 = scmp.ne.s32.totalorder %s293_s18, %s222_s10  ;;  %p228_p13 = scmp.lt.s32.totalorder %s222_s10, %s222_s10 }
  0x1c   :  { %p229_p0 = por %p228_p13, %p227_p12 }
  0x1e   :  { %p230_p1 = pnand %p229_p0, %p223_p11 }
  0x20   :  { %233 = shalt.err (!%p230_p1)
}
  0x21   :  { %s264_s0 = smov 256   ;;  %s265_s11 = smov 16  }
  0x22   :  { %33 = dma.hbm_to_vmem [thread:$0]  %s343_s1, 1024, %s293_s18, [#allocation6], %s264_s0, %s264_s0, %s265_s11  }
  0x23   :  { %256 = dma.done.wait [#allocation3], 64  }
  0x24   :  { %257 = vsyncadd [#allocation3], 4294967232 }
  0x25   :  { %258 = dma.done.wait [#allocation6], 1024  }
  0x26   :  { %259 = vsyncadd [#allocation6], 4294966272  ;;  %v266_v0 = vmov 0   ;;  %v58_v1 = vld [vmem:[#allocation5 + $0x8] sm:$0xff]  ;;  %v57_v2 = vld [vmem:[#allocation5] sm:$0xff]  ;;  %v135_v26 = vlaneseq  ;;  %s267_s17 = smov [#allocation7]  }
  0x27   :  { %115 = vmatprep.mubr.bf16.mxu0 %v266_v0  ;;  %v66_v3 = vunpack.c.l.s8.bf16 %v58_v1  ;;  %v68_v4 = vunpack.c.h.s8.bf16 %v58_v1  ;;  %v65_v5 = vunpack.c.l.s8.bf16 %v57_v2  ;;  %v60_v6 = vld [vmem:[#allocation5 + $0x18] sm:$0xff]  ;;  %v67_v7 = vunpack.c.h.s8.bf16 %v57_v2  ;;  %v59_v9 = vld [vmem:[#allocation5 + $0x10] sm:$0xff]  ;;  %v62_v12 = vld [vmem:[#allocation5 + $0x28] sm:$0xff]  ;;  %s171_s18 = sshll.u32 %s267_s17, 4  ;;  %s172_s18 = int_to_ptr.vmem [resolvable:$true] %s171_s18 }
  0x28   :  { %v70_v8 = vunpack.c.l.s8.bf16 %v60_v6  ;;  %v69_v10 = vunpack.c.l.s8.bf16 %v59_v9  ;;  %v72_v11 = vunpack.c.h.s8.bf16 %v60_v6  ;;  %v71_v13 = vunpack.c.h.s8.bf16 %v59_v9  ;;  %v61_v15 = vld [vmem:[#allocation5 + $0x20] sm:$0xff]  ;;  %v64_v18 = vld [vmem:[#allocation5 + $0x38] sm:$0xff]  ;;  %v63_v21 = vld [vmem:[#allocation5 + $0x30] sm:$0xff]  ;;  %p239_p3 = scmp.lt.s32.totalorder %s172_s18, %s172_s18 }
  0x29   :  { %83 = vmatprep.subr.bf16.mxu0 %v66_v3  ;;  %v74_v14 = vunpack.c.l.s8.bf16 %v62_v12  ;;  %v73_v16 = vunpack.c.l.s8.bf16 %v61_v15  ;;  %v76_v17 = vunpack.c.h.s8.bf16 %v62_v12  ;;  %v75_v19 = vunpack.c.h.s8.bf16 %v61_v15  ;;  %v56_v25 = vld [vmem:[#allocation2] sm:$0xf] }
  0x2a   :  { %84 = vmatpush1.bf16.msra.mxu0 %v65_v5  ;;  %v78_v20 = vunpack.c.l.s8.bf16 %v64_v18  ;;  %v77_v22 = vunpack.c.l.s8.bf16 %v63_v21  ;;  %v80_v23 = vunpack.c.h.s8.bf16 %v64_v18  ;;  %v79_v24 = vunpack.c.h.s8.bf16 %v63_v21  ;;  %v133_v29 = vld [vmem:[%s344_s2] sm:$0x3]  ;;  %s234_s2 = scalar_lea.vmem %s172_s18, 256 }
  0x2b   :  { %85 = vmatprep.subr.bf16.mxu0 %v68_v4  ;;  %v136_v27 = vshrl.u32 %v135_v26, 7  ;;  %v147_v31 = vld [vmem:[%s345_s3] sm:$0x3]  ;;  %p235_p2 = scmp.ne.s32.totalorder %s172_s18, %s234_s2  ;;  %p240_p4 = scmp.lt.s32.totalorder %s234_s2, %s234_s2 }
  0x2d   :  { %v137_v28 = vsub.s32 0, %v136_v27  ;;  %v141_v30 = vsub.s32 1, %v136_v27  ;;  %p241_p5 = por %p240_p4, %p239_p3 }
  0x2e   :  { %86 = vmatpush1.bf16.msra.mxu0 %v67_v7 }
  0x2f   :  { %87 = vmatprep.subr.bf16.mxu0 %v70_v8  ;;  %v138_v32 = vrot.slane %v133_v29, %v137_v28  ;;  %v142_v34 = vrot.slane %v133_v29, %v141_v30  ;;  %v152_v36 = vrot.slane %v147_v31, %v137_v28  ;;  %v156_v38 = vrot.slane %v147_v31, %v141_v30  ;;  %p242_p6 = pnand %p241_p5, %p235_p2 }
  0x32   :  { %88 = vmatpush1.bf16.msra.mxu0 %v69_v10 }
  0x33   :  { %89 = vmatprep.subr.bf16.mxu0 %v72_v11 }
  0x36   :  { %90 = vmatpush1.bf16.msra.mxu0 %v71_v13 }
  0x37   :  { %91 = vmatprep.subr.bf16.mxu0 %v74_v14 }
  0x3a   :  { %92 = vmatpush1.bf16.msra.mxu0 %v73_v16 }
  0x3b   :  { %93 = vmatprep.subr.bf16.mxu0 %v76_v17 }
  0x3e   :  { %94 = vmatpush1.bf16.msra.mxu0 %v75_v19 }
  0x3f   :  { %95 = vmatprep.subr.bf16.mxu0 %v78_v20 }
  0x42   :  { %96 = vmatpush1.bf16.msra.mxu0 %v77_v22 }
  0x43   :  { %97 = vmatprep.subr.bf16.mxu0 %v80_v23 }
  0x46   :  { %98 = vmatpush1.bf16.msra.mxu0 %v79_v24 }
  0x49   :  { %116 = vmatmul.mubr.bf16.vlgmr.msra.gmra.mrb[0].mxu0 %v56_v25 }
 0x11c   :  { %v117_v33 = vpop.f32.mrb[0].mxu0 }
 0x11d   :  { %v119_v35 = vpop.f32.mrb[1].mxu0  ;;  %v145_v40 = vmul.f32 %v138_v32, %v117_v33 }
 0x11e   :  { %v121_v37 = vpop.f32.mrb[2].mxu0  ;;  %v146_v41 = vmul.f32 %v142_v34, %v119_v35 }
 0x11f   :  { %v122_v39 = vpop.f32.mrb[3].mxu0  ;;  %v159_v42 = vadd.f32 %v152_v36, %v145_v40 }
 0x120   :  { %v160_v43 = vadd.f32 %v156_v38, %v146_v41 }
 0x121   :  { %v161_v44 = vmax.f32 %v159_v42, 0.0 }
 0x122   :  { %v162_v45 = vmax.f32 %v160_v43, 0.0 }
 0x123   :  { %163 = vst [vmem:[#allocation7] sm:$0xff] %v161_v44 }
 0x124   :  { %164 = vst [vmem:[#allocation7 + $0x8] sm:$0xff] %v162_v45 }
 0x125   :  { %245 = shalt.err (!%p242_p6)
}
 0x126   :  { %s246_s20 = scalar_lea.hbm %s346_s4, 256 }
 0x127   :  { %p247_p7 = scmp.ne.s32.totalorder %s346_s4, %s246_s20  ;;  %p250_p8 = scmp.lt.u32.totalorder %s246_s20, %s346_s4 }
 0x129   :  { %p252_p9 = pnand %p250_p8, %p247_p7 }
 0x12b   :  { %255 = shalt.err (!%p252_p9)
}
 0x12c   :  { %174 = dma.vmem_to_hbm [thread:$0]  %s172_s18, 256, %s346_s4, [#allocation4]  }
 0x12d   :  { %260 = dma.done.wait [#allocation4], 256  }
 0x12e   :  { %261 = vsyncadd [#allocation4], 4294967040 }
 0x12f   :  { %178 = vsyncpa [#allocation3], 1 }
 0x130   :  { %179 = vsyncpa [#allocation6], 1 }
 0x131   :  { %180 = vsyncpa [#allocation4], 1 }

</bundles_post_ra>
